<compile_context>
chip_gen: v7x
topology: tpu7x:2x2x1
jax: 0.10.0
libtpu: 0.0.40
codegen_flags: <defaults>
</compile_context>

<pallas_src>
import functools

import jax
import jax.numpy as jnp
from jax.experimental import pallas as pl
from jax.experimental.pallas import tpu as pltpu


def _round_up(x, m):
    return (x + m - 1) // m * m


# ----------------------------------------------------------------------------
# Kernel 1: per-node Linear + fold the src-side degree scale into H.
#   Hs[i, :] = d[i] * (h[i, :] @ W.T + b)
# ----------------------------------------------------------------------------
def linear_fold_kernel(h_ref, wT_ref, b_ref, dcol_ref, hs_ref):
    H = jnp.dot(h_ref[...], wT_ref[...],
                preferred_element_type=jnp.float32) + b_ref[...]
    hs_ref[...] = (dcol_ref[...] * H).astype(hs_ref.dtype)


# ----------------------------------------------------------------------------
# Kernel 2: streamed aggregation over dst-row tiles of the adjacency.
#   z_tile = d_tile * (adj_tile @ Hs)
# ----------------------------------------------------------------------------
def aggregate_kernel(adj_ref, hs_ref, dcol_ref, z_ref, *, mxu_dtype):
    a = adj_ref[...]
    hs = hs_ref[...]
    if mxu_dtype is not None:            # e.g. jnp.bfloat16 on v6e/v7x MXU
        a = a.astype(mxu_dtype)
        hs = hs.astype(mxu_dtype)
    acc = jnp.dot(a, hs, preferred_element_type=jnp.float32)
    z_ref[...] = (dcol_ref[...] * acc).astype(z_ref.dtype)
    # TODO(synk): training-mode edge dropout omitted (eval/identity); would use
    # pltpu.prng_seed + pltpu.prng_random_bits to mask/scale the adjacency tile.


def spectral_sgcn1(h, W, b, adj_w, d, *, tile_m=256, mxu_dtype=None):
    """h: (N, F) node feats; W: (F, F) Linear weight; b: (F,) bias;
    adj_w: (N, N) dense signed edge weights (0 = no edge); d: (N,) node scalar.

    tile_m:   dst-row tile (rows of adjacency streamed per grid step). Pick larger
              on v5e/v6e (128 MiB VMEM), smaller on v7x (64 MiB VMEM).
    mxu_dtype: optional cast (e.g. jnp.bfloat16) for the big adj @ Hs matmul;
              accumulation stays f32. Default None keeps exact f32 semantics.
    """
    N, F = h.shape

    # Lane-dense feature dim and sublane-aligned row tiling.
    Fp = _round_up(max(F, 128), 128)
    TM = min(tile_m, _round_up(N, 8))
    TM = _round_up(TM, 8)
    Np = _round_up(N, TM)
    G = Np // TM

    f32 = jnp.float32
    hp = jnp.zeros((Np, Fp), f32).at[:N, :F].set(h.astype(f32))
    wTp = jnp.zeros((Fp, Fp), f32).at[:F, :F].set(W.T.astype(f32))
    bp = jnp.zeros((1, Fp), f32).at[0, :F].set(b.astype(f32))
    adjp = jnp.zeros((Np, Np), f32).at[:N, :N].set(adj_w.astype(f32))
    dcol = jnp.zeros((Np, 1), f32).at[:N, 0].set(d.astype(f32))

    # ---------------- kernel 1: Hs = dcol * (h @ W.T + b) ----------------
    vmem1 = 2 * 4 * (TM * Fp + Fp * Fp + 8 * Fp + TM * 128 + TM * Fp) + (4 << 20)
    hs = pl.pallas_call(
        linear_fold_kernel,
        out_shape=jax.ShapeDtypeStruct((Np, Fp), f32),
        grid=(G,),
        in_specs=[
            pl.BlockSpec((TM, Fp), lambda i: (i, 0)),   # h row tile
            pl.BlockSpec((Fp, Fp), lambda i: (0, 0)),   # W^T (resident)
            pl.BlockSpec((1, Fp), lambda i: (0, 0)),    # bias (resident)
            pl.BlockSpec((TM, 1), lambda i: (i, 0)),    # d column chunk
        ],
        out_specs=pl.BlockSpec((TM, Fp), lambda i: (i, 0)),
        compiler_params=pltpu.CompilerParams(
            dimension_semantics=("parallel",),
            vmem_limit_bytes=min(vmem1, 112 << 20)),
        cost_estimate=pl.CostEstimate(
            flops=2 * Np * Fp * Fp,
            transcendentals=0,
            bytes_accessed=4 * (2 * Np * Fp + Fp * Fp + Fp + Np)),
    )(hp, wTp, bp, dcol)

    # ---------------- kernel 2: z = dcol * (adj @ Hs) ----------------
    vmem2 = 2 * 4 * (TM * Np + Np * Fp + TM * 128 + TM * Fp) + (4 << 20)
    z = pl.pallas_call(
        functools.partial(aggregate_kernel, mxu_dtype=mxu_dtype),
        out_shape=jax.ShapeDtypeStruct((Np, Fp), f32),
        grid=(G,),
        in_specs=[
            pl.BlockSpec((TM, Np), lambda i: (i, 0)),   # adjacency dst-row tile
            pl.BlockSpec((Np, Fp), lambda i: (0, 0)),   # Hs (resident, reused)
            pl.BlockSpec((TM, 1), lambda i: (i, 0)),    # d column chunk (dst scale)
        ],
        out_specs=pl.BlockSpec((TM, Fp), lambda i: (i, 0)),
        compiler_params=pltpu.CompilerParams(
            dimension_semantics=("parallel",),
            vmem_limit_bytes=min(vmem2, 112 << 20)),
        cost_estimate=pl.CostEstimate(
            flops=2 * Np * Np * Fp,
            transcendentals=0,
            bytes_accessed=4 * (Np * Np + 2 * Np * Fp + Np)),
    )(adjp, hs, dcol)

    return z[:N, :F]


if __name__ == "__main__":
    key = jax.random.PRNGKey(0)
    k_w, k_b, k_h, k_m, k_e = jax.random.split(key, 5)

    N = 64        # nodes
    in_dim = 32   # feature dim (Linear is in_dim -> in_dim)

    # nn.Linear(in_dim, in_dim) with xavier_normal_(gain=1.414) on the weight,
    # default uniform(-1/sqrt(fan_in), 1/sqrt(fan_in)) on the bias.
    xavier_std = 1.414 * (2.0 / (in_dim + in_dim)) ** 0.5
    W = xavier_std * jax.random.normal(k_w, (in_dim, in_dim), jnp.float32)
    bound = 1.0 / (in_dim ** 0.5)
    b = jax.random.uniform(k_b, (in_dim,), jnp.float32, -bound, bound)

    # Node features.
    h = jax.random.normal(k_h, (N, in_dim), jnp.float32)

    # Synthetic signed graph: dense (N, N) edge-weight matrix, ~10% density.
    mask = (jax.random.uniform(k_m, (N, N)) < 0.1).astype(jnp.float32)
    w_edge = jax.random.normal(k_e, (N, N), jnp.float32) * mask

    # Per-node scalar ndata['d'] (symmetric normalization: deg^{-1/2}).
    deg = jnp.maximum(mask.sum(axis=1), 1.0)
    d = 1.0 / jnp.sqrt(deg)

    # Exact-f32 MXU path (set mxu_dtype=jnp.bfloat16 on v6e/v7x for ~several-x
    # MXU speedup on the N^2*F matmul if the accuracy budget allows).
    z = spectral_sgcn1(h, W, b, w_edge, d, tile_m=256, mxu_dtype=None)
    z = jax.block_until_ready(z)

    # Pure-JAX reference for the same dense formulation.
    H_ref = h @ W.T + b
    e_ref = d[:, None] * d[None, :] * w_edge
    z_ref = e_ref @ H_ref
    assert jnp.allclose(z, z_ref, atol=1e-4, rtol=1e-4), "mismatch vs reference"

    print("KERNEL_OK")
</pallas_src>

<mosaic_0001>
module attributes {stable_mosaic.version = 11 : i64} {
  func.func @linear_fold_kernel(%arg0: i32, %arg1: memref<64x128xf32, #tpu.memory_space<vmem>>, %arg2: memref<128x128xf32, #tpu.memory_space<vmem>>, %arg3: memref<1x128xf32, #tpu.memory_space<vmem>>, %arg4: memref<64x1xf32, #tpu.memory_space<vmem>>, %arg5: memref<64x128xf32, #tpu.memory_space<vmem>>) attributes {dimension_semantics = [#tpu.dimension_semantics<parallel>], iteration_bounds = array<i64: 1>, scalar_prefetch = 0 : i64, scratch_operands = 0 : i64, tpu.core_type = #tpu.core_type<tc>, window_params = [{transform_indices = @transform_0, window_bounds = array<i64: 64, 128>}, {pipeline_mode = #tpu.pipeline_mode<synchronous>, transform_indices = @transform_1, window_bounds = array<i64: 128, 128>}, {pipeline_mode = #tpu.pipeline_mode<synchronous>, transform_indices = @transform_2, window_bounds = array<i64: 1, 128>}, {transform_indices = @transform_3, window_bounds = array<i64: 64, 1>}, {transform_indices = @transform_4, window_bounds = array<i64: 64, 128>}]} {
    %c0 = arith.constant 0 : index
    %c0_0 = arith.constant 0 : index
    %0 = vector.load %arg1[%c0, %c0_0] : memref<64x128xf32, #tpu.memory_space<vmem>>, vector<64x128xf32>
    %c0_1 = arith.constant 0 : index
    %c0_2 = arith.constant 0 : index
    %1 = vector.load %arg2[%c0_1, %c0_2] : memref<128x128xf32, #tpu.memory_space<vmem>>, vector<128x128xf32>
    %cst = arith.constant dense<0.000000e+00> : vector<64x128xf32>
    %2 = tpu.matmul %0, %1, %cst {dimension_numbers = #tpu.dot_dimension_numbers<[1], [0], [0], [1], [0, 0, 1, 1], [], []>} : vector<64x128xf32>, vector<128x128xf32>, vector<64x128xf32> -> vector<64x128xf32>
    %c0_3 = arith.constant 0 : index
    %c0_4 = arith.constant 0 : index
    %3 = vector.load %arg3[%c0_3, %c0_4] : memref<1x128xf32, #tpu.memory_space<vmem>>, vector<1x128xf32>
    %4 = vector.broadcast %3 : vector<1x128xf32> to vector<64x128xf32>
    %5 = arith.addf %2, %4 : vector<64x128xf32>
    %c0_5 = arith.constant 0 : index
    %c0_6 = arith.constant 0 : index
    %6 = vector.load %arg4[%c0_5, %c0_6] : memref<64x1xf32, #tpu.memory_space<vmem>>, vector<64x1xf32>
    %7 = vector.broadcast %6 : vector<64x1xf32> to vector<64x128xf32>
    %8 = arith.mulf %7, %5 : vector<64x128xf32>
    %c0_7 = arith.constant 0 : index
    %c0_8 = arith.constant 0 : index
    %9 = vector.load %arg5[%c0_7, %c0_8] : memref<64x128xf32, #tpu.memory_space<vmem>>, vector<64x128xf32>
    tpu.vector_store %arg5[%c0_7, %c0_8], %8 {strides = array<i32>} : memref<64x128xf32, #tpu.memory_space<vmem>>, vector<64x128xf32>,
    return
  }
  func.func @transform_0(%arg0: i32) -> (i32, i32) {
    %c0_i32 = arith.constant 0 : i32
    %c0_i32_0 = arith.constant 0 : i32
    return %arg0, %c0_i32 : i32, i32
  }
  func.func @transform_1(%arg0: i32) -> (i32, i32) {
    %c0_i32 = arith.constant 0 : i32
    %c0_i32_0 = arith.constant 0 : i32
    %c0_i32_1 = arith.constant 0 : i32
    return %c0_i32, %c0_i32_0 : i32, i32
  }
  func.func @transform_2(%arg0: i32) -> (i32, i32) {
    %c0_i32 = arith.constant 0 : i32
    %c0_i32_0 = arith.constant 0 : i32
    %c0_i32_1 = arith.constant 0 : i32
    return %c0_i32, %c0_i32_0 : i32, i32
  }
  func.func @transform_3(%arg0: i32) -> (i32, i32) {
    %c0_i32 = arith.constant 0 : i32
    %c0_i32_0 = arith.constant 0 : i32
    return %arg0, %c0_i32 : i32, i32
  }
  func.func @transform_4(%arg0: i32) -> (i32, i32) {
    %c0_i32 = arith.constant 0 : i32
    %c0_i32_0 = arith.constant 0 : i32
    return %arg0, %c0_i32 : i32, i32
  }
}

</mosaic_0001>

<bundles_post_ra>
// kernel: tpu_custom_call.1
= control target key start
LH: loop header
LB: loop body
LE: loop exit
PB: predicated region body
PF: predicated region fallthrough
CT: control target
= control target key end

     0   :  { %9 = vsyncpa [#allocation3], 0  ;;  %s532_s0 = inlined_call_operand.vmem [shape: f32[64,128], index: 0, kind: input, shape index: {}]   ;;  %s533_s1 = inlined_call_operand.hbm [shape: f32[128,128], index: 1, kind: input, shape index: {}]   ;;  %s534_s2 = inlined_call_operand.vmem [shape: f32[1,128], index: 2, kind: input, shape index: {}]   ;;  %s535_s3 = inlined_call_operand.vmem [shape: f32[64,1], index: 3, kind: input, shape index: {}]   ;;  %s536_s4 = inlined_call_operand.hbm [shape: f32[64,128], index: 4, kind: output, shape index: {}]  }
   0x1   :  { %10 = vsyncpa [#allocation4], 0  ;;  %s421_s15 = smov [#allocation2]   ;;  %s373_s19 = scalar_lea.hbm %s533_s1, 2048 }
   0x2   :  { %s18_s16 = sshll.u32 %s421_s15, 4  ;;  %p374_p0 = scmp.ne.s32.totalorder %s533_s1, %s373_s19  ;;  %s19_s16 = int_to_ptr.vmem [resolvable:$true] %s18_s16 }
   0x3   :  { %p377_p1 = scmp.lt.u32.totalorder %s373_s19, %s533_s1 }
   0x5   :  { %p379_p2 = pnand %p377_p1, %p374_p0 }
   0x7   :  { %382 = shalt.err (!%p379_p2)
}
   0x8   :  { %s383_s24 = scalar_lea.vmem %s19_s16, 2048  ;;  %p388_p4 = scmp.lt.s32.totalorder %s19_s16, %s19_s16 }
   0x9   :  { %p384_p3 = scmp.ne.s32.totalorder %s19_s16, %s383_s24  ;;  %p389_p5 = scmp.lt.s32.totalorder %s383_s24, %s383_s24 }
   0xb   :  { %p390_p6 = por %p389_p5, %p388_p4 }
   0xd   :  { %p391_p7 = pnand %p390_p6, %p384_p3 }
   0xf   :  { %394 = shalt.err (!%p391_p7)
}
  0x10   :  { %s422_s25 = smov 128   ;;  %s423_s26 = smov 8  }
  0x11   :  { %24 = dma.hbm_to_vmem [thread:$0]  %s533_s1, 2048, %s19_s16, [#allocation3], %s422_s25, %s422_s25, %s423_s26  }
  0x12   :  { %417 = dma.done.wait [#allocation3], 2048  }
  0x13   :  { %418 = vsyncadd [#allocation3], 4294965248  ;;  %v424_v0 = vmov 0   ;;  %v40_v1 = vld [vmem:[#allocation2] sm:$0xff]  ;;  %v41_v2 = vld [vmem:[#allocation2 + $0x8] sm:$0xff] }
  0x14   :  { %372 = vset.pattern.permute.xlu1 %v424_v0  ;;  %371 = vset.pattern.permute.xlu0 %v424_v0  ;;  %v42_v3 = vld [vmem:[#allocation2 + $0x10] sm:$0xff]  ;;  %v318_v4 = vpack.c.bf16 %v41_v2, %v40_v1  ;;  %v43_v5 = vld [vmem:[#allocation2 + $0x18] sm:$0xff]  ;;  %v44_v7 = vld [vmem:[#allocation2 + $0x20] sm:$0xff] }
  0x15   :  { %v322_v6 = vpack.c.bf16 %v43_v5, %v42_v3  ;;  %v45_v8 = vld [vmem:[#allocation2 + $0x28] sm:$0xff]  ;;  %v32_v10 = vld [vmem:[%s532_s0] sm:$0xff]  ;;  %v46_v12 = vld [vmem:[#allocation2 + $0x30] sm:$0xff] }
  0x16   :  { %319 = vmatprep.subr.bf16.mxu0 %v318_v4  ;;  %350 = vmatprep.subr.bf16.mxu1 %v318_v4  ;;  %v326_v9 = vpack.c.bf16 %v45_v8, %v44_v7  ;;  %v36_v11 = vld [vmem:[%s532_s0 + $0x20] sm:$0xff]  ;;  %v47_v13 = vld [vmem:[#allocation2 + $0x38] sm:$0xff]  ;;  %v170_v14 = vld [vmem:[%s535_s3 + $0x10] sm:$0xff] }
  0x17   :  { %321 = vmatpush3.bf16.msra.mxu0 %v318_v4  ;;  %358 = vmatpush3.bf16.msra.mxu1 %v318_v4  ;;  %v168_v15 = vld [vmem:[%s535_s3] sm:$0xff]  ;;  %v330_v16 = vpack.c.bf16 %v47_v13, %v46_v12  ;;  %v49_v18 = vld [vmem:[#allocation2 + $0x48] sm:$0xff]  ;;  %v171_v19 = vld [vmem:[%s535_s3 + $0x18] sm:$0xff] }
  0x18   :  { %323 = vmatprep.subr.bf16.mxu0 %v322_v6  ;;  %351 = vmatprep.subr.bf16.mxu1 %v322_v6  ;;  %v48_v17 = vld [vmem:[#allocation2 + $0x40] sm:$0xff]  ;;  %v169_v20 = vld [vmem:[%s535_s3 + $0x8] sm:$0xff]  ;;  %v50_v22 = vld [vmem:[#allocation2 + $0x50] sm:$0xff] }
  0x19   :  { %306 = vmatprep.mubr.f32.mxu0 %v32_v10  ;;  %312 = vmatprep.mubr.f32.mxu1 %v36_v11  ;;  %v334_v21 = vpack.c.bf16 %v49_v18, %v48_v17  ;;  %v51_v23 = vld [vmem:[#allocation2 + $0x58] sm:$0xff]  ;;  %v173_v24 = vld [vmem:[%s535_s3 + $0x28] sm:$0xff]  ;;  %v172_v25 = vld [vmem:[%s535_s3 + $0x20] sm:$0xff] }
  0x1a   :  { %188 = vperm.xlu1 %372, %v170_v14   ;;  %178 = vperm.xlu0 %371, %v168_v15   ;;  %v338_v26 = vpack.c.bf16 %v51_v23, %v50_v22  ;;  %v52_v27 = vld [vmem:[#allocation2 + $0x60] sm:$0xff]  ;;  %v53_v28 = vld [vmem:[#allocation2 + $0x68] sm:$0xff]  ;;  %v175_v29 = vld [vmem:[%s535_s3 + $0x38] sm:$0xff] }
  0x1b   :  { %325 = vmatpush3.bf16.msra.mxu0 %v322_v6  ;;  %359 = vmatpush3.bf16.msra.mxu1 %v322_v6  ;;  %v174_v30 = vld [vmem:[%s535_s3 + $0x30] sm:$0xff]  ;;  %v342_v31 = vpack.c.bf16 %v53_v28, %v52_v27  ;;  %v55_v33 = vld [vmem:[#allocation2 + $0x78] sm:$0xff]  ;;  %v33_v35 = vld [vmem:[%s532_s0 + $0x8] sm:$0xff] }
  0x1c   :  { %327 = vmatprep.subr.bf16.mxu0 %v326_v9  ;;  %352 = vmatprep.subr.bf16.mxu1 %v326_v9  ;;  %v54_v32 = vld [vmem:[#allocation2 + $0x70] sm:$0xff]  ;;  %v37_v36 = vld [vmem:[%s532_s0 + $0x28] sm:$0xff]  ;;  %v35_v39 = vld [vmem:[%s532_s0 + $0x18] sm:$0xff] }
  0x1d   :  { %v346_v34 = vpack.c.bf16 %v55_v33, %v54_v32  ;;  %v34_v37 = vld [vmem:[%s532_s0 + $0x10] sm:$0xff]  ;;  %v39_v40 = vld [vmem:[%s532_s0 + $0x38] sm:$0xff]  ;;  %v249_v45 = vld [vmem:[%s534_s2] ss:$0 sm:$0xff] }
  0x1e   :  { %193 = vperm.xlu1 %372, %v171_v19   ;;  %183 = vperm.xlu0 %371, %v169_v20   ;;  %v38_v38 = vld [vmem:[%s532_s0 + $0x30] sm:$0xff]  ;;  %s425_s0 = smov [#allocation5]  }
  0x1f   :  { %329 = vmatpush3.bf16.msra.mxu0 %v326_v9  ;;  %360 = vmatpush3.bf16.msra.mxu1 %v326_v9  ;;  %s237_s2 = sshll.u32 %s425_s0, 4  ;;  %s238_s2 = int_to_ptr.vmem [resolvable:$true] %s237_s2 }
  0x20   :  { %331 = vmatprep.subr.bf16.mxu0 %v330_v16  ;;  %353 = vmatprep.subr.bf16.mxu1 %v330_v16  ;;  %s395_s10 = scalar_lea.vmem %s238_s2, 1024  ;;  %p400_p9 = scmp.lt.s32.totalorder %s238_s2, %s238_s2 }
  0x21   :  { %p396_p8 = scmp.ne.s32.totalorder %s238_s2, %s395_s10  ;;  %p401_p10 = scmp.lt.s32.totalorder %s395_s10, %s395_s10 }
  0x22   :  { %203 = vperm.xlu1 %372, %v173_v24   ;;  %198 = vperm.xlu0 %371, %v172_v25  }
  0x23   :  { %333 = vmatpush3.bf16.msra.mxu0 %v330_v16  ;;  %361 = vmatpush3.bf16.msra.mxu1 %v330_v16  ;;  %p402_p11 = por %p401_p10, %p400_p9 }
  0x24   :  { %335 = vmatprep.subr.bf16.mxu0 %v334_v21  ;;  %354 = vmatprep.subr.bf16.mxu1 %v334_v21 }
  0x25   :  { %p403_p12 = pnand %p402_p11, %p396_p8 }
  0x26   :  { %213 = vperm.xlu1 %372, %v175_v29   ;;  %208 = vperm.xlu0 %371, %v174_v30  }
  0x27   :  { %337 = vmatpush3.bf16.msra.mxu0 %v334_v21  ;;  %362 = vmatpush3.bf16.msra.mxu1 %v334_v21 }
  0x28   :  { %339 = vmatprep.subr.bf16.mxu0 %v338_v26  ;;  %355 = vmatprep.subr.bf16.mxu1 %v338_v26 }
  0x2b   :  { %341 = vmatpush3.bf16.msra.mxu0 %v338_v26  ;;  %363 = vmatpush3.bf16.msra.mxu1 %v338_v26 }
  0x2c   :  { %343 = vmatprep.subr.bf16.mxu0 %v342_v31  ;;  %356 = vmatprep.subr.bf16.mxu1 %v342_v31 }
  0x2f   :  { %345 = vmatpush3.bf16.msra.mxu0 %v342_v31  ;;  %364 = vmatpush3.bf16.msra.mxu1 %v342_v31 }
  0x30   :  { %347 = vmatprep.subr.bf16.mxu0 %v346_v34  ;;  %357 = vmatprep.subr.bf16.mxu1 %v346_v34 }
  0x33   :  { %349 = vmatpush3.bf16.msra.mxu0 %v346_v34  ;;  %365 = vmatpush3.bf16.msra.mxu1 %v346_v34 }
  0x36   :  { %307 = vmatmul.mubr.f32.vlgmr.msra.gmra.mrb[0].mxu0 %v33_v35  ;;  %313 = vmatmul.mubr.f32.vlgmr.msra.gmra.mrb[0].mxu1 %v37_v36 }
  0x37   :  { %309 = vmatprep.mubr.f32.mxu0 %v34_v37  ;;  %315 = vmatprep.mubr.f32.mxu1 %v38_v38 }
  0x3a   :  { %310 = vmatmul.mubr.f32.gmra.mrb[2].mxu0 %v35_v39  ;;  %316 = vmatmul.mubr.f32.gmra.mrb[2].mxu1 %v39_v40 }
  0x99   :  { %v189_v41 = vpop.permute.xlu1 %188  ;;  %v179_v42 = vpop.permute.xlu0 %178 }
  0x9d   :  { %v194_v43 = vpop.permute.xlu1 %193  ;;  %v184_v44 = vpop.permute.xlu0 %183 }
  0xa1   :  { %v204_v46 = vpop.permute.xlu1 %203  ;;  %v199_v47 = vpop.permute.xlu0 %198 }
  0xa5   :  { %v214_v2 = vpop.permute.xlu1 %213  ;;  %v209_v5 = vpop.permute.xlu0 %208 }
 0x109   :  { %v308_v48 = vpop.f32.mrb[0].mxu0  ;;  %v314_v49 = vpop.f32.mrb[0].mxu1 }
 0x10a   :  { %v135_v50 = vadd.f32 %v308_v48, %v249_v45  ;;  %v155_v51 = vadd.f32 %v314_v49, %v249_v45  ;;  %v129_v52 = vpop.f32.mrb[1].mxu0  ;;  %v149_v53 = vpop.f32.mrb[1].mxu1 }
 0x10b   :  { %v130_v54 = vadd.f32 %v249_v45, %v129_v52  ;;  %v150_v55 = vadd.f32 %v249_v45, %v149_v53 }
 0x10c   :  { %v217_v56 = vmul.f32 %v184_v44, %v135_v50  ;;  %v221_v57 = vmul.f32 %v204_v46, %v155_v51 }
 0x10d   :  { %v216_v58 = vmul.f32 %v179_v42, %v130_v54  ;;  %v220_v59 = vmul.f32 %v199_v47, %v150_v55  ;;  %v311_v60 = vpop.f32.mrb[2].mxu0  ;;  %v317_v61 = vpop.f32.mrb[2].mxu1 }
 0x10e   :  { %225 = vst [vmem:[#allocation5 + $0x8] sm:$0xff] %v217_v56  ;;  %229 = vst [vmem:[#allocation5 + $0x28] sm:$0xff] %v221_v57  ;;  %v145_v62 = vadd.f32 %v311_v60, %v249_v45  ;;  %v165_v63 = vadd.f32 %v317_v61, %v249_v45  ;;  %v139_v0 = vpop.f32.mrb[3].mxu0  ;;  %v159_v1 = vpop.f32.mrb[3].mxu1 }
 0x10f   :  { %224 = vst [vmem:[#allocation5] sm:$0xff] %v216_v58  ;;  %228 = vst [vmem:[#allocation5 + $0x20] sm:$0xff] %v220_v59  ;;  %v140_v3 = vadd.f32 %v249_v45, %v139_v0  ;;  %v160_v4 = vadd.f32 %v249_v45, %v159_v1 }
 0x110   :  { %v219_v6 = vmul.f32 %v194_v43, %v145_v62  ;;  %v223_v7 = vmul.f32 %v214_v2, %v165_v63 }
 0x111   :  { %v218_v8 = vmul.f32 %v189_v41, %v140_v3  ;;  %v222_v9 = vmul.f32 %v209_v5, %v160_v4 }
 0x112   :  { %227 = vst [vmem:[#allocation5 + $0x18] sm:$0xff] %v219_v6  ;;  %231 = vst [vmem:[#allocation5 + $0x38] sm:$0xff] %v223_v7 }
 0x113   :  { %226 = vst [vmem:[#allocation5 + $0x10] sm:$0xff] %v218_v8  ;;  %230 = vst [vmem:[#allocation5 + $0x30] sm:$0xff] %v222_v9 }
 0x114   :  { %406 = shalt.err (!%p403_p12)
}
 0x115   :  { %s407_s13 = scalar_lea.hbm %s536_s4, 1024 }
 0x116   :  { %p408_p13 = scmp.ne.s32.totalorder %s536_s4, %s407_s13  ;;  %p411_p0 = scmp.lt.u32.totalorder %s407_s13, %s536_s4 }
 0x118   :  { %p413_p1 = pnand %p411_p0, %p408_p13 }
 0x11a   :  { %416 = shalt.err (!%p413_p1)
}
 0x11b   :  { %243 = dma.vmem_to_hbm [thread:$0]  %s238_s2, 1024, %s536_s4, [#allocation4], %s422_s25, %s422_s25, %s423_s26  }
 0x11c   :  { %419 = dma.done.wait [#allocation4], 1024  }
 0x11d   :  { %420 = vsyncadd [#allocation4], 4294966272 }
 0x11e   :  { %247 = vsyncpa [#allocation3], 1 }
 0x11f   :  { %248 = vsyncpa [#allocation4], 1 }

</bundles_post_ra>
